<compile_context>
chip_gen: v5e
topology: v5e:2x2
jax: 0.10.0
libtpu: 0.0.40
codegen_flags: <defaults>
</compile_context>

<pallas_src>
import jax
import jax.numpy as jnp
from jax.experimental import pallas as pl
from jax.experimental.pallas import tpu as pltpu


def _round_up(n, m):
    return ((n + m - 1) // m) * m


def adapter_kernel(x_ref, wd_ref, bd_ref, wu_ref, bu_ref, o_ref):
    # x_ref: (tm, D)   wd_ref: (D, Bp)  bd_ref: (1, Bp)
    # wu_ref: (Bp, D)  bu_ref: (1, D)   o_ref: (tm, D)
    x = x_ref[...]
    # down projection (MXU, f32 accumulation) + bias + ReLU
    h = jnp.dot(x.astype(wd_ref.dtype), wd_ref[...],
                preferred_element_type=jnp.float32)
    h = jnp.maximum(h + bd_ref[...].astype(jnp.float32), 0.0)
    # up projection (MXU, f32 accumulation) + bias
    y = jnp.dot(h.astype(wu_ref.dtype), wu_ref[...],
                preferred_element_type=jnp.float32)
    y = y + bu_ref[...].astype(jnp.float32)
    # residual add in f32, cast to output dtype
    # NOTE: no cross-row coupling here — required so the ragged last M-block
    # (whose out-of-range input rows hold unspecified values) stays safe.
    o_ref[...] = (y + x.astype(jnp.float32)).astype(o_ref.dtype)


def _default_vmem_budget_bytes():
    # Generation-aware: ~0.75x physical VMEM (128 MiB on v5e/v6e -> ~96 MiB,
    # 64 MiB per TensorCore on v7x -> ~48 MiB).  Conservative fallback if the
    # trace-time query is unavailable.
    try:
        cap = int(pltpu.get_tpu_info().vmem_capacity_bytes)
        return max(32 << 20, int(0.75 * cap))
    except Exception:
        return 48 << 20


def adapter_forward(x, w_down, b_down, w_up, b_up, *, tm=512,
                    matmul_dtype=None, vmem_budget_bytes=None):
    """Fused adapter forward.

    x:       [batch, seq, D]          (pass bf16 to halve HBM traffic; output
                                       dtype follows x.dtype)
    w_down:  [D, B]  (pre-transposed, i.e. [in, out])
    b_down:  [B]
    w_up:    [B, D]
    b_up:    [D]
    matmul_dtype: optional dtype (e.g. jnp.bfloat16) for the matmul *weight*
        operands; accumulation, bias add and residual stay f32.  Using bf16
        loosens accuracy vs. an f32 reference (expected).
    """
    batch, seq, D = x.shape
    B = w_down.shape[1]
    M = batch * seq

    act_dtype = jnp.dtype(x.dtype)
    act_bytes = act_dtype.itemsize
    w_dtype = (jnp.dtype(matmul_dtype) if matmul_dtype is not None
               else jnp.dtype(w_down.dtype))
    w_bytes = w_dtype.itemsize

    if vmem_budget_bytes is None:
        vmem_budget_bytes = _default_vmem_budget_bytes()

    # Pad only the bottleneck (lane) dim of the *weights* to a multiple of 128
    # (cheap — weights are tiny); padded columns/rows contribute exact zeros.
    # Activations are never padded: D uses a full-dim block, M stays ragged.
    Bp = _round_up(B, 128)
    if Bp != B:
        wd = jnp.zeros((D, Bp), dtype=w_dtype).at[:, :B].set(w_down.astype(w_dtype))
        wu = jnp.zeros((Bp, D), dtype=w_dtype).at[:B, :].set(w_up.astype(w_dtype))
        bd = jnp.zeros((1, Bp), dtype=jnp.float32).at[0, :B].set(
            b_down.astype(jnp.float32))
    else:
        wd = w_down.astype(w_dtype)
        wu = w_up.astype(w_dtype)
        bd = b_down.astype(jnp.float32).reshape(1, B)
    bu = b_up.astype(jnp.float32).reshape(1, D)

    # ---------------- Row-tile selection ----------------
    tm = max(128, _round_up(int(tm), 128))
    # Guarantee >=2 grid steps when there is enough work, so ("parallel",)
    # spreads the M axis across both TensorCores on v7x.
    if M >= 256:
        tm = min(tm, _round_up(-(-M // 2), 128))

    def vmem_needed(t):
        act = 2 * 2 * t * D * act_bytes            # x & out tiles, double buffered
        wts = (D * Bp + Bp * D) * w_bytes          # resident weights (single buffer)
        bias = (Bp + D) * 4
        tmp = t * (Bp + 2 * D) * 4                 # f32 intermediates (h, y/residual)
        return act + wts + bias + tmp

    # Shrink tm until it fits the per-core VMEM budget.
    while vmem_needed(tm) > vmem_budget_bytes and tm > 128:
        tm //= 2
    tm = max(128, tm)
    # Never larger than the (sublane-rounded) row count; keep a multiple of 8.
    tm = min(tm, _round_up(M, 8))
    tm = max(8, (tm // 8) * 8)

    grid = (pl.cdiv(M, tm),)

    x2d = x.reshape(M, D)                          # no copy, no padding

    flops = 4 * M * D * Bp                         # two matmuls
    bytes_accessed = (2 * M * D * act_bytes        # x in + out
                      + 2 * D * Bp * w_bytes       # both weight matrices
                      + (Bp + D) * 4)              # biases
    vmem_limit = int(min(max(vmem_needed(tm) + (8 << 20), 32 << 20),
                         vmem_budget_bytes))

    def build(single_buffer_resident):
        def resident(shape):
            # Constant index_map -> never needs double buffering.
            if single_buffer_resident:
                return pl.BlockSpec(shape, lambda i: (0, 0),
                                    pipeline_mode=pl.Buffered(1))
            return pl.BlockSpec(shape, lambda i: (0, 0))

        return pl.pallas_call(
            adapter_kernel,
            out_shape=jax.ShapeDtypeStruct((M, D), act_dtype),
            grid_spec=pltpu.PrefetchScalarGridSpec(
                num_scalar_prefetch=0,
                grid=grid,
                in_specs=[
                    pl.BlockSpec((tm, D), lambda i: (i, 0)),   # streamed x tile
                    resident((D, Bp)),                         # w_down (resident)
                    resident((1, Bp)),                         # b_down
                    resident((Bp, D)),                         # w_up (resident)
                    resident((1, D)),                          # b_up
                ],
                out_specs=pl.BlockSpec((tm, D), lambda i: (i, 0)),
            ),
            compiler_params=pltpu.CompilerParams(
                dimension_semantics=("parallel",),   # megacore sharding on v7x
                vmem_limit_bytes=vmem_limit,
            ),
            cost_estimate=pl.CostEstimate(
                flops=int(flops),
                transcendentals=0,
                bytes_accessed=int(bytes_accessed),
            ),
        )

    try:
        out2d = build(True)(x2d, wd, bd, wu, bu)
    except Exception:
        # Fallback if this jax build rejects pipeline_mode=pl.Buffered(1).
        out2d = build(False)(x2d, wd, bd, wu, bu)

    return out2d.reshape(batch, seq, D)


def adapter_reference(x, w_down, b_down, w_up, b_up):
    h = jnp.maximum(x @ w_down + b_down, 0.0)
    return h @ w_up + b_up + x


if __name__ == "__main__":
    # Small shapes consistent with the module: batch=2, seq=8, hidden(input_dim)=32,
    # bottleneck_dim=64 (the module default).
    batch, seq, input_dim, bottleneck_dim = 2, 8, 32, 64

    key = jax.random.PRNGKey(0)
    kx, kwd, kbd, kwu, kbu = jax.random.split(key, 5)

    x = jax.random.normal(kx, (batch, seq, input_dim), dtype=jnp.float32)

    # Deterministic parameter init (PyTorch-Linear-style uniform bounds),
    # stored pre-transposed as [in, out] for the kernel.
    lim_d = 1.0 / jnp.sqrt(jnp.float32(input_dim))
    lim_u = 1.0 / jnp.sqrt(jnp.float32(bottleneck_dim))
    w_down = jax.random.uniform(kwd, (input_dim, bottleneck_dim),
                                minval=-lim_d, maxval=lim_d, dtype=jnp.float32)
    b_down = jax.random.uniform(kbd, (bottleneck_dim,),
                                minval=-lim_d, maxval=lim_d, dtype=jnp.float32)
    w_up = jax.random.uniform(kwu, (bottleneck_dim, input_dim),
                              minval=-lim_u, maxval=lim_u, dtype=jnp.float32)
    b_up = jax.random.uniform(kbu, (input_dim,),
                              minval=-lim_u, maxval=lim_u, dtype=jnp.float32)

    out = adapter_forward(x, w_down, b_down, w_up, b_up)
    out = jax.block_until_ready(out)

    ref = adapter_reference(x, w_down, b_down, w_up, b_up)
    assert out.shape == x.shape
    assert jnp.allclose(out, ref, atol=1e-5, rtol=1e-5)

    print("KERNEL_OK")
</pallas_src>

<mosaic_0001>
module attributes {stable_mosaic.version = 11 : i64} {
  func.func @adapter_kernel(%arg0: i32, %arg1: memref<16x32xf32, #tpu.memory_space<vmem>>, %arg2: memref<32x128xf32, #tpu.memory_space<vmem>>, %arg3: memref<1x128xf32, #tpu.memory_space<vmem>>, %arg4: memref<128x32xf32, #tpu.memory_space<vmem>>, %arg5: memref<1x32xf32, #tpu.memory_space<vmem>>, %arg6: memref<16x32xf32, #tpu.memory_space<vmem>>) attributes {dimension_semantics = [#tpu.dimension_semantics<parallel>], iteration_bounds = array<i64: 1>, scalar_prefetch = 0 : i64, scratch_operands = 0 : i64, tpu.core_type = #tpu.core_type<tc>, window_params = [{transform_indices = @transform_0, window_bounds = array<i64: 16, 32>}, {pipeline_mode = #tpu.pipeline_mode<synchronous>, transform_indices = @transform_1, window_bounds = array<i64: 32, 128>}, {pipeline_mode = #tpu.pipeline_mode<synchronous>, transform_indices = @transform_2, window_bounds = array<i64: 1, 128>}, {pipeline_mode = #tpu.pipeline_mode<synchronous>, transform_indices = @transform_3, window_bounds = array<i64: 128, 32>}, {pipeline_mode = #tpu.pipeline_mode<synchronous>, transform_indices = @transform_4, window_bounds = array<i64: 1, 32>}, {transform_indices = @transform_5, window_bounds = array<i64: 16, 32>}]} {
    %c0 = arith.constant 0 : index
    %c0_0 = arith.constant 0 : index
    %0 = vector.load %arg1[%c0, %c0_0] : memref<16x32xf32, #tpu.memory_space<vmem>>, vector<16x32xf32>
    %c0_1 = arith.constant 0 : index
    %c0_2 = arith.constant 0 : index
    %1 = vector.load %arg2[%c0_1, %c0_2] : memref<32x128xf32, #tpu.memory_space<vmem>>, vector<32x128xf32>
    %cst = arith.constant dense<0.000000e+00> : vector<16x128xf32>
    %2 = tpu.matmul %0, %1, %cst {dimension_numbers = #tpu.dot_dimension_numbers<[1], [0], [0], [1], [0, 0, 1, 1], [], []>} : vector<16x32xf32>, vector<32x128xf32>, vector<16x128xf32> -> vector<16x128xf32>
    %c0_3 = arith.constant 0 : index
    %c0_4 = arith.constant 0 : index
    %3 = vector.load %arg3[%c0_3, %c0_4] : memref<1x128xf32, #tpu.memory_space<vmem>>, vector<1x128xf32>
    %4 = vector.broadcast %3 : vector<1x128xf32> to vector<16x128xf32>
    %5 = arith.addf %2, %4 : vector<16x128xf32>
    %cst_5 = arith.constant 0.000000e+00 : f32
    %6 = vector.broadcast %cst_5 : f32 to vector<16x128xf32>
    %7 = arith.maximumf %5, %6 : vector<16x128xf32>
    %c0_6 = arith.constant 0 : index
    %c0_7 = arith.constant 0 : index
    %8 = vector.load %arg4[%c0_6, %c0_7] : memref<128x32xf32, #tpu.memory_space<vmem>>, vector<128x32xf32>
    %cst_8 = arith.constant dense<0.000000e+00> : vector<16x32xf32>
    %9 = tpu.matmul %7, %8, %cst_8 {dimension_numbers = #tpu.dot_dimension_numbers<[1], [0], [0], [1], [0, 0, 1, 1], [], []>} : vector<16x128xf32>, vector<128x32xf32>, vector<16x32xf32> -> vector<16x32xf32>
    %c0_9 = arith.constant 0 : index
    %c0_10 = arith.constant 0 : index
    %10 = vector.load %arg5[%c0_9, %c0_10] : memref<1x32xf32, #tpu.memory_space<vmem>>, vector<1x32xf32>
    %11 = vector.broadcast %10 : vector<1x32xf32> to vector<16x32xf32>
    %12 = arith.addf %9, %11 : vector<16x32xf32>
    %13 = arith.addf %12, %0 : vector<16x32xf32>
    %c0_11 = arith.constant 0 : index
    %c0_12 = arith.constant 0 : index
    %14 = vector.load %arg6[%c0_11, %c0_12] : memref<16x32xf32, #tpu.memory_space<vmem>>, vector<16x32xf32>
    tpu.vector_store %arg6[%c0_11, %c0_12], %13 {strides = array<i32>} : memref<16x32xf32, #tpu.memory_space<vmem>>, vector<16x32xf32>,
    return
  }
  func.func @transform_0(%arg0: i32) -> (i32, i32) {
    %c0_i32 = arith.constant 0 : i32
    %c0_i32_0 = arith.constant 0 : i32
    return %arg0, %c0_i32 : i32, i32
  }
  func.func @transform_1(%arg0: i32) -> (i32, i32) {
    %c0_i32 = arith.constant 0 : i32
    %c0_i32_0 = arith.constant 0 : i32
    %c0_i32_1 = arith.constant 0 : i32
    return %c0_i32, %c0_i32_0 : i32, i32
  }
  func.func @transform_2(%arg0: i32) -> (i32, i32) {
    %c0_i32 = arith.constant 0 : i32
    %c0_i32_0 = arith.constant 0 : i32
    %c0_i32_1 = arith.constant 0 : i32
    return %c0_i32, %c0_i32_0 : i32, i32
  }
  func.func @transform_3(%arg0: i32) -> (i32, i32) {
    %c0_i32 = arith.constant 0 : i32
    %c0_i32_0 = arith.constant 0 : i32
    %c0_i32_1 = arith.constant 0 : i32
    return %c0_i32, %c0_i32_0 : i32, i32
  }
  func.func @transform_4(%arg0: i32) -> (i32, i32) {
    %c0_i32 = arith.constant 0 : i32
    %c0_i32_0 = arith.constant 0 : i32
    %c0_i32_1 = arith.constant 0 : i32
    return %c0_i32, %c0_i32_0 : i32, i32
  }
  func.func @transform_5(%arg0: i32) -> (i32, i32) {
    %c0_i32 = arith.constant 0 : i32
    %c0_i32_0 = arith.constant 0 : i32
    return %arg0, %c0_i32 : i32, i32
  }
}

module attributes {stable_mosaic.version = 11 : i64} {
  func.func @adapter_kernel(%arg0: i32, %arg1: memref<16x32xf32, #tpu.memory_space<vmem>>, %arg2: memref<32x128xf32, #tpu.memory_space<vmem>>, %arg3: memref<1x128xf32, #tpu.memory_space<vmem>>, %arg4: memref<128x32xf32, #tpu.memory_space<vmem>>, %arg5: memref<1x32xf32, #tpu.memory_space<vmem>>, %arg6: memref<16x32xf32, #tpu.memory_space<vmem>>) attributes {dimension_semantics = [#tpu.dimension_semantics<parallel>], iteration_bounds = array<i64: 1>, scalar_prefetch = 0 : i64, scratch_operands = 0 : i64, tpu.core_type = #tpu.core_type<tc>, window_params = [{transform_indices = @transform_0, window_bounds = array<i64: 16, 32>}, {pipeline_mode = #tpu.pipeline_mode<synchronous>, transform_indices = @transform_1, window_bounds = array<i64: 32, 128>}, {pipeline_mode = #tpu.pipeline_mode<synchronous>, transform_indices = @transform_2, window_bounds = array<i64: 1, 128>}, {pipeline_mode = #tpu.pipeline_mode<synchronous>, transform_indices = @transform_3, window_bounds = array<i64: 128, 32>}, {pipeline_mode = #tpu.pipeline_mode<synchronous>, transform_indices = @transform_4, window_bounds = array<i64: 1, 32>}, {transform_indices = @transform_5, window_bounds = array<i64: 16, 32>}]} {
    %c0 = arith.constant 0 : index
    %c0_0 = arith.constant 0 : index
    %0 = vector.load %arg1[%c0, %c0_0] : memref<16x32xf32, #tpu.memory_space<vmem>>, vector<16x32xf32>
    %c0_1 = arith.constant 0 : index
    %c0_2 = arith.constant 0 : index
    %1 = vector.load %arg2[%c0_1, %c0_2] : memref<32x128xf32, #tpu.memory_space<vmem>>, vector<32x128xf32>
    %cst = arith.constant dense<0.000000e+00> : vector<16x128xf32>
    %2 = tpu.matmul %0, %1, %cst {dimension_numbers = #tpu.dot_dimension_numbers<[1], [0], [0], [1], [0, 0, 1, 1], [], []>} : vector<16x32xf32>, vector<32x128xf32>, vector<16x128xf32> -> vector<16x128xf32>
    %c0_3 = arith.constant 0 : index
    %c0_4 = arith.constant 0 : index
    %3 = vector.load %arg3[%c0_3, %c0_4] : memref<1x128xf32, #tpu.memory_space<vmem>>, vector<1x128xf32>
    %4 = vector.broadcast %3 : vector<1x128xf32> to vector<16x128xf32>
    %5 = arith.addf %2, %4 : vector<16x128xf32>
    %cst_5 = arith.constant 0.000000e+00 : f32
    %6 = vector.broadcast %cst_5 : f32 to vector<16x128xf32>
    %7 = arith.maximumf %5, %6 : vector<16x128xf32>
    %c0_6 = arith.constant 0 : index
    %c0_7 = arith.constant 0 : index
    %8 = vector.load %arg4[%c0_6, %c0_7] : memref<128x32xf32, #tpu.memory_space<vmem>>, vector<128x32xf32>
    %cst_8 = arith.constant dense<0.000000e+00> : vector<16x32xf32>
    %9 = tpu.matmul %7, %8, %cst_8 {dimension_numbers = #tpu.dot_dimension_numbers<[1], [0], [0], [1], [0, 0, 1, 1], [], []>} : vector<16x128xf32>, vector<128x32xf32>, vector<16x32xf32> -> vector<16x32xf32>
    %c0_9 = arith.constant 0 : index
    %c0_10 = arith.constant 0 : index
    %10 = vector.load %arg5[%c0_9, %c0_10] : memref<1x32xf32, #tpu.memory_space<vmem>>, vector<1x32xf32>
    %11 = vector.broadcast %10 : vector<1x32xf32> to vector<16x32xf32>
    %12 = arith.addf %9, %11 : vector<16x32xf32>
    %13 = arith.addf %12, %0 : vector<16x32xf32>
    %c0_11 = arith.constant 0 : index
    %c0_12 = arith.constant 0 : index
    %14 = vector.load %arg6[%c0_11, %c0_12] : memref<16x32xf32, #tpu.memory_space<vmem>>, vector<16x32xf32>
    tpu.vector_store %arg6[%c0_11, %c0_12], %13 {strides = array<i32>} : memref<16x32xf32, #tpu.memory_space<vmem>>, vector<16x32xf32>,
    return
  }
  func.func @transform_0(%arg0: i32) -> (i32, i32) {
    %c0_i32 = arith.constant 0 : i32
    %c0_i32_0 = arith.constant 0 : i32
    return %arg0, %c0_i32 : i32, i32
  }
  func.func @transform_1(%arg0: i32) -> (i32, i32) {
    %c0_i32 = arith.constant 0 : i32
    %c0_i32_0 = arith.constant 0 : i32
    %c0_i32_1 = arith.constant 0 : i32
    return %c0_i32, %c0_i32_0 : i32, i32
  }
  func.func @transform_2(%arg0: i32) -> (i32, i32) {
    %c0_i32 = arith.constant 0 : i32
    %c0_i32_0 = arith.constant 0 : i32
    %c0_i32_1 = arith.constant 0 : i32
    return %c0_i32, %c0_i32_0 : i32, i32
  }
  func.func @transform_3(%arg0: i32) -> (i32, i32) {
    %c0_i32 = arith.constant 0 : i32
    %c0_i32_0 = arith.constant 0 : i32
    %c0_i32_1 = arith.constant 0 : i32
    return %c0_i32, %c0_i32_0 : i32, i32
  }
  func.func @transform_4(%arg0: i32) -> (i32, i32) {
    %c0_i32 = arith.constant 0 : i32
    %c0_i32_0 = arith.constant 0 : i32
    %c0_i32_1 = arith.constant 0 : i32
    return %c0_i32, %c0_i32_0 : i32, i32
  }
  func.func @transform_5(%arg0: i32) -> (i32, i32) {
    %c0_i32 = arith.constant 0 : i32
    %c0_i32_0 = arith.constant 0 : i32
    return %arg0, %c0_i32 : i32, i32
  }
}

</mosaic_0001>

<bundles_post_ra>
// kernel: tpu_custom_call.1
= control target key start
LH: loop header
LB: loop body
LE: loop exit
PB: predicated region body
PF: predicated region fallthrough
CT: control target
= control target key end

     0   :  { %vm31_vm0 = vcmask 261120   ;;  %s289_s0 = inlined_call_operand.vmem [shape: f32[16,32], index: 0, kind: input, shape index: {}]   ;;  %s290_s1 = inlined_call_operand.vmem [shape: f32[32,128], index: 1, kind: input, shape index: {}]   ;;  %s291_s2 = inlined_call_operand.vmem [shape: f32[1,128], index: 2, kind: input, shape index: {}]   ;;  %s292_s3 = inlined_call_operand.vmem [shape: f32[128,32], index: 3, kind: input, shape index: {}]   ;;  %s293_s4 = inlined_call_operand.vmem [shape: f32[1,32], index: 4, kind: input, shape index: {}]   ;;  %s294_s5 = inlined_call_operand.hbm [shape: f32[16,32], index: 5, kind: output, shape index: {}]  }
   0x1   :  { %v26_v0 = vld [vmem:[%s290_s1 + $0x18] sm:$0xff]  ;;  %v25_v1 = vld [vmem:[%s290_s1 + $0x10] sm:$0xff]  ;;  %v24_v2 = vld [vmem:[%s290_s1 + $0x8] sm:$0xff] }
   0x2   :  { %50 = vmatpush.msra.mxu0 %v26_v0  ;;  %v78_v3 = vld [vmem:[%s292_s3 + $0x78] sm:$0xff]  ;;  %v77_v4 = vld [vmem:[%s292_s3 + $0x70] sm:$0xff]  ;;  %v23_v5 = vld [vmem:[%s290_s1] sm:$0xff] }
   0x3   :  { %83 = vmatpush.msra.mxu1 %v78_v3  ;;  %v76_v6 = vld [vmem:[%s292_s3 + $0x68] sm:$0xff]  ;;  %130 = vmatpush.msra.mxu2 %v78_v3  ;;  %v21_v7 = vld [vmem:[%s289_s0] sm:$0xff] }
   0x4   :  { %51 = vmatpush.msra.mxu0 %v25_v1  ;;  %v75_v8 = vld [vmem:[%s292_s3 + $0x60] sm:$0xff] }
   0x5   :  { %84 = vmatpush.msra.mxu1 %v77_v4  ;;  %131 = vmatpush.msra.mxu2 %v77_v4 }
   0x6   :  { %52 = vmatpush.msra.mxu0 %v24_v2 }
   0x7   :  { %85 = vmatpush.msra.mxu1 %v76_v6 }
   0x8   :  { %53 = vmatpush.msra.mxu0 %v23_v5 }
   0x9   :  { %10 = vsyncpa [#allocation3], 0  ;;  %128 = vmatmul.msk.f32.vlgmr.msra.gmra.mxu0 %vm31_vm0, %v21_v7  ;;  %v74_v9 = vld [vmem:[%s292_s3 + $0x58] sm:$0xff]  ;;  %132 = vmatpush.msra.mxu2 %v76_v6  ;;  %v73_v10 = vld [vmem:[%s292_s3 + $0x50] sm:$0xff]  ;;  %s116_s15 = sshll.u32 %s294_s5, 4  ;;  %s178_s16 = smov 128   ;;  %s117_s15 = int_to_ptr.hbm [resolvable:$true] %s116_s15 }
   0xa   :  { %86 = vmatpush.msra.mxu1 %v75_v8  ;;  %v72_v11 = vld [vmem:[%s292_s3 + $0x48] sm:$0xff]  ;;  %v71_v13 = vld [vmem:[%s292_s3 + $0x40] sm:$0xff]  ;;  %v70_v14 = vld [vmem:[%s292_s3 + $0x38] sm:$0xff] }
   0xb   :  { %133 = vmatpush.msra.mxu2 %v75_v8  ;;  %v22_v12 = vld [vmem:[%s289_s0 + $0x8] sm:$0xff]  ;;  %v69_v15 = vld [vmem:[%s292_s3 + $0x30] sm:$0xff]  ;;  %v67_v17 = vld [vmem:[%s292_s3 + $0x20] sm:$0xff] }
   0xc   :  { %87 = vmatpush.msra.mxu1 %v74_v9  ;;  %v68_v16 = vld [vmem:[%s292_s3 + $0x28] sm:$0xff]  ;;  %v66_v18 = vld [vmem:[%s292_s3 + $0x18] sm:$0xff]  ;;  %v65_v19 = vld [vmem:[%s292_s3 + $0x10] sm:$0xff] }
   0xd   :  { %134 = vmatpush.msra.mxu2 %v74_v9  ;;  %v64_v20 = vld [vmem:[%s292_s3 + $0x8] sm:$0xff]  ;;  %v63_v21 = vld [vmem:[%s292_s3] sm:$0xff]  ;;  %s177_s3 = smov [#allocation2]  }
   0xe   :  { %88 = vmatpush.msra.mxu1 %v73_v10  ;;  %v149_v22 = vld [vmem:[%s291_s2] ss:$0 sm:$0xff]  ;;  %s114_s13 = sshll.u32 %s177_s3, 4  ;;  %s115_s13 = int_to_ptr.vmem [resolvable:$true] %s114_s13 }
   0xf   :  { %135 = vmatpush.msra.mxu2 %v73_v10  ;;  %v150_v29 = vld [vmem:[%s293_s4] ss:$0 sm:$0xff]  ;;  %s179_s4 = smov 8  }
  0x10   :  { %89 = vmatpush.msra.mxu1 %v72_v11 }
  0x11   :  { %129 = vmatmul.msk.f32.gmra.mxu0 %vm31_vm0, %v22_v12  ;;  %136 = vmatpush.msra.mxu2 %v72_v11 }
  0x12   :  { %90 = vmatpush.msra.mxu1 %v71_v13 }
  0x13   :  { %137 = vmatpush.msra.mxu2 %v71_v13 }
  0x14   :  { %91 = vmatpush.msra.mxu1 %v70_v14 }
  0x15   :  { %138 = vmatpush.msra.mxu2 %v70_v14 }
  0x16   :  { %92 = vmatpush.msra.mxu1 %v69_v15 }
  0x17   :  { %139 = vmatpush.msra.mxu2 %v69_v15 }
  0x18   :  { %93 = vmatpush.msra.mxu1 %v68_v16 }
  0x19   :  { %140 = vmatpush.msra.mxu2 %v68_v16 }
  0x1a   :  { %94 = vmatpush.msra.mxu1 %v67_v17 }
  0x1b   :  { %141 = vmatpush.msra.mxu2 %v67_v17 }
  0x1c   :  { %95 = vmatpush.msra.mxu1 %v66_v18 }
  0x1d   :  { %142 = vmatpush.msra.mxu2 %v66_v18 }
  0x1e   :  { %96 = vmatpush.msra.mxu1 %v65_v19 }
  0x1f   :  { %143 = vmatpush.msra.mxu2 %v65_v19 }
  0x20   :  { %97 = vmatpush.msra.mxu1 %v64_v20 }
  0x21   :  { %144 = vmatpush.msra.mxu2 %v64_v20 }
  0x22   :  { %98 = vmatpush.msra.mxu1 %v63_v21 }
  0x23   :  { %145 = vmatpush.msra.mxu2 %v63_v21 }
  0x86   :  { %v55_v23 = vpop.f32.mrf.mxu0 }
  0x87   :  { %v56_v24 = vadd.f32 %v149_v22, %v55_v23 }
  0x89   :  { %v61_v25 = vmax.f32 %v56_v24, 0.0 }
  0x8b   :  { %99 = vmatmul.f32.vlgmr.msra.gmra.mxu1 %v61_v25 }
  0x8e   :  { %v58_v26 = vpop.f32.mrf.mxu0 }
  0x8f   :  { %v59_v27 = vadd.f32 %v149_v22, %v58_v26 }
  0x91   :  { %v62_v28 = vmax.f32 %v59_v27, 0.0 }
  0x93   :  { %102 = vmatmul.f32.vlgmr.msra.gmra.mxu2 %v62_v28 }
 0x108   :  { %v100_v30 = vpop.f32.mrf.mxu1 }
 0x109   :  { %v101_v31 = vadd.f32 %v150_v29, %v100_v30 }
 0x10b   :  { %v106_v32 = vadd.f32 %v101_v31, %v21_v7 }
 0x10d   :  { %108 = vst.msk [vmem:[#allocation2] sm:$0xff] %vm31_vm0, %v106_v32 }
 0x116   :  { %v103_v33 = vpop.f32.mrf.mxu2 }
 0x117   :  { %v104_v34 = vadd.f32 %v150_v29, %v103_v33 }
 0x119   :  { %v107_v35 = vadd.f32 %v104_v34, %v22_v12 }
 0x11b   :  { %109 = vst.msk [vmem:[#allocation2 + $0x8] sm:$0xff] %vm31_vm0, %v107_v35 }
 0x11c   :  { %122 = dma.vmem_to_hbm [thread:$0]  %s115_s13, 256, %s117_s15, [#allocation3], %s178_s16, %s178_s16, %s179_s4  }
 0x11d   :  { %175 = dma.done.wait [#allocation3], 256  }
 0x11e   :  { %176 = vsyncadd [#allocation3], 4294967040 }
 0x11f   :  { %127 = vsyncpa [#allocation3], 1 }

// kernel: tpu_custom_call.1
= control target key start
LH: loop header
LB: loop body
LE: loop exit
PB: predicated region body
PF: predicated region fallthrough
CT: control target
= control target key end

     0   :  { %vm31_vm0 = vcmask 261120   ;;  %s289_s0 = inlined_call_operand.vmem [shape: f32[16,32], index: 0, kind: input, shape index: {}]   ;;  %s290_s1 = inlined_call_operand.vmem [shape: f32[32,128], index: 1, kind: input, shape index: {}]   ;;  %s291_s2 = inlined_call_operand.vmem [shape: f32[1,128], index: 2, kind: input, shape index: {}]   ;;  %s292_s3 = inlined_call_operand.vmem [shape: f32[128,32], index: 3, kind: input, shape index: {}]   ;;  %s293_s4 = inlined_call_operand.vmem [shape: f32[1,32], index: 4, kind: input, shape index: {}]   ;;  %s294_s5 = inlined_call_operand.hbm [shape: f32[16,32], index: 5, kind: output, shape index: {}]  }
   0x1   :  { %v26_v0 = vld [vmem:[%s290_s1 + $0x18] sm:$0xff]  ;;  %v25_v1 = vld [vmem:[%s290_s1 + $0x10] sm:$0xff]  ;;  %v24_v2 = vld [vmem:[%s290_s1 + $0x8] sm:$0xff] }
   0x2   :  { %50 = vmatpush.msra.mxu0 %v26_v0  ;;  %v78_v3 = vld [vmem:[%s292_s3 + $0x78] sm:$0xff]  ;;  %v77_v4 = vld [vmem:[%s292_s3 + $0x70] sm:$0xff]  ;;  %v23_v5 = vld [vmem:[%s290_s1] sm:$0xff] }
   0x3   :  { %83 = vmatpush.msra.mxu1 %v78_v3  ;;  %v76_v6 = vld [vmem:[%s292_s3 + $0x68] sm:$0xff]  ;;  %130 = vmatpush.msra.mxu2 %v78_v3  ;;  %v21_v7 = vld [vmem:[%s289_s0] sm:$0xff] }
   0x4   :  { %51 = vmatpush.msra.mxu0 %v25_v1  ;;  %v75_v8 = vld [vmem:[%s292_s3 + $0x60] sm:$0xff] }
   0x5   :  { %84 = vmatpush.msra.mxu1 %v77_v4  ;;  %131 = vmatpush.msra.mxu2 %v77_v4 }
   0x6   :  { %52 = vmatpush.msra.mxu0 %v24_v2 }
   0x7   :  { %85 = vmatpush.msra.mxu1 %v76_v6 }
   0x8   :  { %53 = vmatpush.msra.mxu0 %v23_v5 }
   0x9   :  { %10 = vsyncpa [#allocation3], 0  ;;  %128 = vmatmul.msk.f32.vlgmr.msra.gmra.mxu0 %vm31_vm0, %v21_v7  ;;  %v74_v9 = vld [vmem:[%s292_s3 + $0x58] sm:$0xff]  ;;  %132 = vmatpush.msra.mxu2 %v76_v6  ;;  %v73_v10 = vld [vmem:[%s292_s3 + $0x50] sm:$0xff]  ;;  %s116_s15 = sshll.u32 %s294_s5, 4  ;;  %s178_s16 = smov 128   ;;  %s117_s15 = int_to_ptr.hbm [resolvable:$true] %s116_s15 }
   0xa   :  { %86 = vmatpush.msra.mxu1 %v75_v8  ;;  %v72_v11 = vld [vmem:[%s292_s3 + $0x48] sm:$0xff]  ;;  %v71_v13 = vld [vmem:[%s292_s3 + $0x40] sm:$0xff]  ;;  %v70_v14 = vld [vmem:[%s292_s3 + $0x38] sm:$0xff] }
   0xb   :  { %133 = vmatpush.msra.mxu2 %v75_v8  ;;  %v22_v12 = vld [vmem:[%s289_s0 + $0x8] sm:$0xff]  ;;  %v69_v15 = vld [vmem:[%s292_s3 + $0x30] sm:$0xff]  ;;  %v67_v17 = vld [vmem:[%s292_s3 + $0x20] sm:$0xff] }
   0xc   :  { %87 = vmatpush.msra.mxu1 %v74_v9  ;;  %v68_v16 = vld [vmem:[%s292_s3 + $0x28] sm:$0xff]  ;;  %v66_v18 = vld [vmem:[%s292_s3 + $0x18] sm:$0xff]  ;;  %v65_v19 = vld [vmem:[%s292_s3 + $0x10] sm:$0xff] }
   0xd   :  { %134 = vmatpush.msra.mxu2 %v74_v9  ;;  %v64_v20 = vld [vmem:[%s292_s3 + $0x8] sm:$0xff]  ;;  %v63_v21 = vld [vmem:[%s292_s3] sm:$0xff]  ;;  %s177_s3 = smov [#allocation2]  }
   0xe   :  { %88 = vmatpush.msra.mxu1 %v73_v10  ;;  %v149_v22 = vld [vmem:[%s291_s2] ss:$0 sm:$0xff]  ;;  %s114_s13 = sshll.u32 %s177_s3, 4  ;;  %s115_s13 = int_to_ptr.vmem [resolvable:$true] %s114_s13 }
   0xf   :  { %135 = vmatpush.msra.mxu2 %v73_v10  ;;  %v150_v29 = vld [vmem:[%s293_s4] ss:$0 sm:$0xff]  ;;  %s179_s4 = smov 8  }
  0x10   :  { %89 = vmatpush.msra.mxu1 %v72_v11 }
  0x11   :  { %129 = vmatmul.msk.f32.gmra.mxu0 %vm31_vm0, %v22_v12  ;;  %136 = vmatpush.msra.mxu2 %v72_v11 }
  0x12   :  { %90 = vmatpush.msra.mxu1 %v71_v13 }
  0x13   :  { %137 = vmatpush.msra.mxu2 %v71_v13 }
  0x14   :  { %91 = vmatpush.msra.mxu1 %v70_v14 }
  0x15   :  { %138 = vmatpush.msra.mxu2 %v70_v14 }
  0x16   :  { %92 = vmatpush.msra.mxu1 %v69_v15 }
  0x17   :  { %139 = vmatpush.msra.mxu2 %v69_v15 }
  0x18   :  { %93 = vmatpush.msra.mxu1 %v68_v16 }
  0x19   :  { %140 = vmatpush.msra.mxu2 %v68_v16 }
  0x1a   :  { %94 = vmatpush.msra.mxu1 %v67_v17 }
  0x1b   :  { %141 = vmatpush.msra.mxu2 %v67_v17 }
  0x1c   :  { %95 = vmatpush.msra.mxu1 %v66_v18 }
  0x1d   :  { %142 = vmatpush.msra.mxu2 %v66_v18 }
  0x1e   :  { %96 = vmatpush.msra.mxu1 %v65_v19 }
  0x1f   :  { %143 = vmatpush.msra.mxu2 %v65_v19 }
  0x20   :  { %97 = vmatpush.msra.mxu1 %v64_v20 }
  0x21   :  { %144 = vmatpush.msra.mxu2 %v64_v20 }
  0x22   :  { %98 = vmatpush.msra.mxu1 %v63_v21 }
  0x23   :  { %145 = vmatpush.msra.mxu2 %v63_v21 }
  0x86   :  { %v55_v23 = vpop.f32.mrf.mxu0 }
  0x87   :  { %v56_v24 = vadd.f32 %v149_v22, %v55_v23 }
  0x89   :  { %v61_v25 = vmax.f32 %v56_v24, 0.0 }
  0x8b   :  { %99 = vmatmul.f32.vlgmr.msra.gmra.mxu1 %v61_v25 }
  0x8e   :  { %v58_v26 = vpop.f32.mrf.mxu0 }
  0x8f   :  { %v59_v27 = vadd.f32 %v149_v22, %v58_v26 }
  0x91   :  { %v62_v28 = vmax.f32 %v59_v27, 0.0 }
  0x93   :  { %102 = vmatmul.f32.vlgmr.msra.gmra.mxu2 %v62_v28 }
 0x108   :  { %v100_v30 = vpop.f32.mrf.mxu1 }
 0x109   :  { %v101_v31 = vadd.f32 %v150_v29, %v100_v30 }
 0x10b   :  { %v106_v32 = vadd.f32 %v101_v31, %v21_v7 }
 0x10d   :  { %108 = vst.msk [vmem:[#allocation2] sm:$0xff] %vm31_vm0, %v106_v32 }
 0x116   :  { %v103_v33 = vpop.f32.mrf.mxu2 }
 0x117   :  { %v104_v34 = vadd.f32 %v150_v29, %v103_v33 }
 0x119   :  { %v107_v35 = vadd.f32 %v104_v34, %v22_v12 }
 0x11b   :  { %109 = vst.msk [vmem:[#allocation2 + $0x8] sm:$0xff] %vm31_vm0, %v107_v35 }
 0x11c   :  { %122 = dma.vmem_to_hbm [thread:$0]  %s115_s13, 256, %s117_s15, [#allocation3], %s178_s16, %s178_s16, %s179_s4  }
 0x11d   :  { %175 = dma.done.wait [#allocation3], 256  }
 0x11e   :  { %176 = vsyncadd [#allocation3], 4294967040 }
 0x11f   :  { %127 = vsyncpa [#allocation3], 1 }

</bundles_post_ra>
